<compile_context>
chip_gen: v7x
topology: tpu7x:2x2x1
jax: 0.10.0
libtpu: 0.0.40
codegen_flags: <defaults>
</compile_context>

<pallas_src>
import numpy as np
from functools import partial

import jax
import jax.numpy as jnp
from jax.experimental import pallas as pl
from jax.experimental.pallas import tpu as pltpu

_LANE = 128
# Beyond this many reduced elements per row we also tile the reduction axis.
_R_TILE_THRESHOLD = 8192


def _cdiv(a, b):
    return (a + b - 1) // b


def _sublane(dtype):
    itemsize = jnp.dtype(dtype).itemsize
    return 8 if itemsize >= 4 else (16 if itemsize == 2 else 32)


def _vmem_config():
    """Generation-aware VMEM budgeting.

    v5e/v6e have 128 MiB physical VMEM per TensorCore, v7x only 64 MiB (but
    ~2.3x the HBM bandwidth, so it still wants the largest tiles that fit).
    We use 3/4 of physical (capped at 64 MiB) as the scoped-VMEM limit and
    budget the in-flight bytes (double-buffered input tiles + f32 working set)
    at ~3/4 of that limit.
    """
    phys = 64 * 1024 * 1024  # conservative default if the query fails
    try:
        info = pltpu.get_tpu_info()
        cap = getattr(info, "vmem_capacity_bytes", None)
        if cap:
            phys = int(cap)
    except Exception:
        pass
    vmem_limit = min((phys * 3) // 4, 64 * 1024 * 1024)
    usable = (vmem_limit * 3) // 4
    return usable, vmem_limit


# --------------------------------------------------------------------------
# Kernels
# --------------------------------------------------------------------------
def _mean_full_r_lane_dense_kernel(x_ref, o_ref, *, inv_r):
    """(tk, R) tile -> (1, tk) lane-dense means.  Requires R % 128 == 0."""
    r = x_ref.shape[1]
    # Stream lane-aligned 128-wide chunks through one (tk, 128) f32
    # accumulator (VALU adds), keeping a single large live buffer.
    acc = x_ref[:, 0:_LANE].astype(jnp.float32)
    for c in range(1, r // _LANE):
        acc = acc + x_ref[:, c * _LANE:(c + 1) * _LANE].astype(jnp.float32)
    # Lane-dense output: (tk, 128) -> (128, tk) on the XLU (otherwise idle
    # under the HBM DMA), then a sublane-axis reduce gives an unmasked,
    # 128-lane-dense (1, tk) store instead of a (tk, 1) column of vst.msk.
    s = jnp.sum(jnp.transpose(acc), axis=0, keepdims=True)  # (1, tk)
    o_ref[...] = (s * inv_r).astype(o_ref.dtype)


def _mean_full_r_col_kernel(x_ref, o_ref, *, inv_r):
    """(tk, R) tile -> (tk, 1) means.  Fallback for R % 128 != 0 / tiny K."""
    x = x_ref[...].astype(jnp.float32)
    s = jnp.sum(x, axis=-1, keepdims=True)
    o_ref[...] = (s * inv_r).astype(o_ref.dtype)


def _mean_tiled_r_kernel(x_ref, o_ref, acc_ref, *, r_total, tr, inv_r,
                         lane_dense):
    """R-tiled path: grid = (K tiles, R tiles), f32 accumulator in VMEM."""
    r_idx = pl.program_id(1)
    nr = pl.num_programs(1)

    @pl.when(r_idx == 0)
    def _init():
        acc_ref[...] = jnp.zeros_like(acc_ref)

    def _partial(x):
        if lane_dense:
            p = x[:, 0:_LANE]
            for c in range(1, tr // _LANE):
                p = p + x[:, c * _LANE:(c + 1) * _LANE]
            return p                                   # (tk, 128)
        return jnp.sum(x, axis=-1, keepdims=True)      # (tk, 1)

    needs_mask = (r_total % tr) != 0
    if needs_mask:
        # Only the final (partial) R tile pays the iota+select mask; the bulk
        # steps stay pure VALU adds hidden under the DMA.
        @pl.when(r_idx == nr - 1)
        def _last():
            x = x_ref[...].astype(jnp.float32)
            col = jax.lax.broadcasted_iota(jnp.int32, x.shape, 1) + r_idx * tr
            acc_ref[...] = acc_ref[...] + _partial(
                jnp.where(col < r_total, x, 0.0))

        @pl.when(r_idx < nr - 1)
        def _bulk():
            acc_ref[...] = acc_ref[...] + _partial(
                x_ref[...].astype(jnp.float32))
    else:
        acc_ref[...] = acc_ref[...] + _partial(x_ref[...].astype(jnp.float32))

    @pl.when(r_idx == nr - 1)
    def _finish():
        if lane_dense:
            s = jnp.sum(jnp.transpose(acc_ref[...]), axis=0,
                        keepdims=True)                 # (1, tk) lane-dense
        else:
            s = acc_ref[...]                           # (tk, 1)
        o_ref[...] = (s * inv_r).astype(o_ref.dtype)


def _mean_mid_kernel(x_ref, o_ref, acc_ref, *, r_total, tr, inv_r):
    """Reduce the middle axis of a (tko, tr, tki) block: no HBM transpose.

    Output (tko, tki) keeps K_inner on lanes, so it is lane-dense for free.
    """
    r_idx = pl.program_id(2)
    nr = pl.num_programs(2)

    @pl.when(r_idx == 0)
    def _init():
        acc_ref[...] = jnp.zeros_like(acc_ref)

    def _mid_sum(x):
        if tr <= 8:  # tiny reduce extents: plain unrolled VALU adds
            s = x[:, 0, :]
            for j in range(1, tr):
                s = s + x[:, j, :]
            return s
        return jnp.sum(x, axis=1)

    needs_mask = (r_total % tr) != 0
    if needs_mask:
        @pl.when(r_idx == nr - 1)
        def _last():
            x = x_ref[...].astype(jnp.float32)
            row = jax.lax.broadcasted_iota(jnp.int32, x.shape, 1) + r_idx * tr
            acc_ref[...] = acc_ref[...] + _mid_sum(
                jnp.where(row < r_total, x, 0.0))

        @pl.when(r_idx < nr - 1)
        def _bulk():
            acc_ref[...] = acc_ref[...] + _mid_sum(
                x_ref[...].astype(jnp.float32))
    else:
        acc_ref[...] = acc_ref[...] + _mid_sum(x_ref[...].astype(jnp.float32))

    @pl.when(r_idx == nr - 1)
    def _finish():
        o_ref[...] = (acc_ref[...] * inv_r).astype(o_ref.dtype)


# --------------------------------------------------------------------------
# Wrappers
# --------------------------------------------------------------------------
def _pick_rows(K, per_row_bytes, align, usable, block_rows=None):
    if block_rows is not None:
        tk = max(1, min(int(block_rows), K))
    else:
        tk = max(1, min(K, usable // max(1, per_row_bytes)))
    if tk < K:
        tk = max(align, (tk // align) * align)
    return tk


def _mean_last_axis(x2, block_rows=None, block_cols=None):
    """Row means of a (K, R) array -> (K,)."""
    K, R = (int(s) for s in x2.shape)
    dtype = x2.dtype
    itemsize = jnp.dtype(dtype).itemsize
    sublane = _sublane(dtype)
    usable, vmem_limit = _vmem_config()
    inv_r = 1.0 / float(R)

    tile_r = (((block_cols is not None) or (R > _R_TILE_THRESHOLD))
              and R >= _LANE)

    if not tile_r:
        lane_dense = (R % _LANE == 0) and (K >= sublane)
        if lane_dense:
            # double-buffered input row + ~4 f32 (·,128) working rows
            per_row = 2 * R * itemsize + 4 * _LANE * 4
            tk = _pick_rows(K, per_row, sublane, usable, block_rows)
            if tk == K and K % sublane != 0:
                tk = (K // sublane) * sublane  # keep the transpose 8-aligned
            grid_k = _cdiv(K, tk)
            out = pl.pallas_call(
                partial(_mean_full_r_lane_dense_kernel, inv_r=inv_r),
                out_shape=jax.ShapeDtypeStruct((grid_k, tk), dtype),
                grid=(grid_k,),
                in_specs=[pl.BlockSpec((tk, R), lambda i: (i, 0))],
                out_specs=pl.BlockSpec((1, tk), lambda i: (i, 0)),
                compiler_params=pltpu.CompilerParams(
                    dimension_semantics=("parallel",),
                    vmem_limit_bytes=vmem_limit),
            )(x2)
            return out.reshape(grid_k * tk)[:K]
        # Column-output fallback (odd R or tiny K): proven simple path.
        per_row = 2 * R * itemsize + 4 * R + 256
        tk = _pick_rows(K, per_row, sublane, usable, block_rows)
        out = pl.pallas_call(
            partial(_mean_full_r_col_kernel, inv_r=inv_r),
            out_shape=jax.ShapeDtypeStruct((K, 1), dtype),
            grid=(_cdiv(K, tk),),
            in_specs=[pl.BlockSpec((tk, R), lambda i: (i, 0))],
            out_specs=pl.BlockSpec((tk, 1), lambda i: (i, 0)),
            compiler_params=pltpu.CompilerParams(
                dimension_semantics=("parallel",),
                vmem_limit_bytes=vmem_limit),
        )(x2)
        return out.reshape(K)

    # ---- R-tiled path (large reduction axis) ----
    tr = int(block_cols) if block_cols is not None else min(R, 4096)
    tr = max(_LANE, min(tr, R))
    tr = (tr // _LANE) * _LANE
    lane_dense = K >= sublane
    per_row = 2 * tr * itemsize + 4 * tr + 6 * _LANE * 4
    tk = _pick_rows(K, per_row, sublane, usable, block_rows)
    if lane_dense and tk == K and K % sublane != 0:
        tk = (K // sublane) * sublane
    grid_k = _cdiv(K, tk)
    grid_r = _cdiv(R, tr)

    if lane_dense:
        out_shape = jax.ShapeDtypeStruct((grid_k, tk), dtype)
        out_spec = pl.BlockSpec((1, tk), lambda i, r: (i, 0))
        acc_shape = pltpu.VMEM((tk, _LANE), jnp.float32)
    else:
        out_shape = jax.ShapeDtypeStruct((K, 1), dtype)
        out_spec = pl.BlockSpec((tk, 1), lambda i, r: (i, 0))
        acc_shape = pltpu.VMEM((tk, 1), jnp.float32)

    out = pl.pallas_call(
        partial(_mean_tiled_r_kernel, r_total=R, tr=tr, inv_r=inv_r,
                lane_dense=lane_dense),
        out_shape=out_shape,
        grid=(grid_k, grid_r),
        in_specs=[pl.BlockSpec((tk, tr), lambda i, r: (i, r))],
        out_specs=out_spec,
        scratch_shapes=[acc_shape],
        compiler_params=pltpu.CompilerParams(
            dimension_semantics=("parallel", "arbitrary"),
            vmem_limit_bytes=vmem_limit),
    )(x2)
    if lane_dense:
        return out.reshape(grid_k * tk)[:K]
    return out.reshape(K)


def _mean_middle_axis(x3):
    """Means over the middle axis of a (Ko, R, Ki) array -> (Ko, Ki)."""
    Ko, R, Ki = (int(s) for s in x3.shape)
    dtype = x3.dtype
    itemsize = jnp.dtype(dtype).itemsize
    sublane = _sublane(dtype)
    usable, vmem_limit = _vmem_config()
    inv_r = 1.0 / float(R)

    # ~bytes of VMEM in flight per input element: double-buffered input tile
    # plus one f32 temporary of the same footprint.
    per_elem = 2 * itemsize + 4
    elem_budget = max(sublane * _LANE, usable // per_elem)

    if Ki <= max(_LANE, elem_budget // sublane):
        tki = Ki
    else:
        tki = max(_LANE, ((elem_budget // sublane) // _LANE) * _LANE)
    if R <= max(1, elem_budget // tki):
        tr = R
    else:
        tr = max(sublane, ((elem_budget // tki) // sublane) * sublane)
    tko = max(1, min(Ko, elem_budget // max(1, tr * tki)))
    if tko < Ko:
        tko = max(1, (tko // sublane) * sublane)

    grid = (_cdiv(Ko, tko), _cdiv(Ki, tki), _cdiv(R, tr))
    out = pl.pallas_call(
        partial(_mean_mid_kernel, r_total=R, tr=tr, inv_r=inv_r),
        out_shape=jax.ShapeDtypeStruct((Ko, Ki), dtype),
        grid=grid,
        in_specs=[pl.BlockSpec((tko, tr, tki),
                               lambda io, ii, ir: (io, ir, ii))],
        out_specs=pl.BlockSpec((tko, tki), lambda io, ii, ir: (io, ii)),
        scratch_shapes=[pltpu.VMEM((tko, tki), jnp.float32)],
        compiler_params=pltpu.CompilerParams(
            dimension_semantics=("parallel", "parallel", "arbitrary"),
            vmem_limit_bytes=vmem_limit),
    )(x3)
    return out


def pallas_mean(x, dim, keep_dim=False, *, block_rows=None, block_cols=None):
    """Equivalent of torch.Tensor.mean(dim, keepdim) implemented with Pallas."""
    if isinstance(dim, int):
        dims = (dim,)
    else:
        dims = tuple(dim)
    ndim = x.ndim
    dims = tuple(sorted(set(d % ndim for d in dims)))

    if not jnp.issubdtype(x.dtype, jnp.floating):
        # torch.mean also rejects integer dtypes.
        raise TypeError("pallas_mean only supports floating-point inputs.")
    if not dims:
        return x

    # Split reduced dims into maximal contiguous runs and reduce them back to
    # front with no-transpose kernels (mean of means == mean since every
    # group has equal size) -- no HBM transpose pass is ever issued.
    runs = []
    start = prev = dims[0]
    for d in dims[1:]:
        if d == prev + 1:
            prev = d
        else:
            runs.append((start, prev))
            start = prev = d
    runs.append((start, prev))

    y = x
    for d0, d1 in reversed(runs):
        shape = y.shape
        Ko = int(np.prod(shape[:d0])) if d0 > 0 else 1
        R = int(np.prod(shape[d0:d1 + 1]))
        Ki = int(np.prod(shape[d1 + 1:])) if d1 + 1 < len(shape) else 1
        out_shape = tuple(shape[:d0]) + tuple(shape[d1 + 1:])
        if Ki == 1:
            red = _mean_last_axis(y.reshape(Ko, R),
                                  block_rows=block_rows,
                                  block_cols=block_cols)
        else:
            red = _mean_middle_axis(y.reshape(Ko, R, Ki)).reshape(Ko * Ki)
        y = red.reshape(out_shape)

    if keep_dim:
        full = tuple(1 if i in dims else x.shape[i] for i in range(ndim))
        y = y.reshape(full)
    return y


class Mean:
    """Drop-in analogue of the PyTorch Mean module."""

    def __init__(self, dim, keep_dim=False):
        self.dim = dim
        self.keep_dim = keep_dim

    def __call__(self, x):
        return pallas_mean(x, self.dim, self.keep_dim)


if __name__ == "__main__":
    root = jax.random.PRNGKey(0)
    keys = jax.random.split(root, 8)

    # 1) Typical LVC_blocks usage: spatial mean of an NCHW tensor
    #    (lane-dense full-R path, R=256, K=8).
    x = jax.random.normal(keys[0], (2, 4, 16, 16), dtype=jnp.float32)
    m = Mean(dim=[2, 3], keep_dim=False)
    y = m(x)
    jax.block_until_ready(y)
    ref = jnp.mean(x, axis=(2, 3))
    assert y.shape == ref.shape
    np.testing.assert_allclose(np.asarray(y), np.asarray(ref),
                               rtol=1e-5, atol=1e-5)

    y_keep = Mean(dim=[2, 3], keep_dim=True)(x)
    jax.block_until_ready(y_keep)
    np.testing.assert_allclose(np.asarray(y_keep),
                               np.asarray(jnp.mean(x, axis=(2, 3),
                                                   keepdims=True)),
                               rtol=1e-5, atol=1e-5)

    # 2) K-tiled lane-dense path with a partial trailing K tile (K=15, tk=8).
    x2 = jax.random.normal(keys[1], (3, 5, 16, 16), jnp.float32)
    y2 = pallas_mean(x2, dim=[2, 3], block_rows=8)
    jax.block_until_ready(y2)
    np.testing.assert_allclose(np.asarray(y2),
                               np.asarray(jnp.mean(x2, axis=(2, 3))),
                               rtol=1e-5, atol=1e-5)

    # 3) R-tiled accumulator path: masked partial trailing R tile (R=320).
    x3 = jax.random.normal(keys[2], (2, 4, 16, 20), jnp.float32)
    y3 = pallas_mean(x3, dim=[2, 3], block_cols=128)
    jax.block_until_ready(y3)
    np.testing.assert_allclose(np.asarray(y3),
                               np.asarray(jnp.mean(x3, axis=(2, 3))),
                               rtol=1e-5, atol=1e-5)

    # 4) Non-trailing reduce dim -> middle-axis kernel (no HBM transpose).
    x4 = jax.random.normal(keys[3], (2, 4, 16, 16), jnp.float32)
    y4 = pallas_mean(x4, dim=1, keep_dim=True)
    jax.block_until_ready(y4)
    np.testing.assert_allclose(np.asarray(y4),
                               np.asarray(jnp.mean(x4, axis=1, keepdims=True)),
                               rtol=1e-5, atol=1e-5)

    # 5) Full-R path with R not a multiple of 128 (lane-pad masking in Mosaic).
    x5 = jax.random.normal(keys[4], (2, 3, 5, 10), jnp.float32)
    y5 = pallas_mean(x5, dim=[2, 3])
    jax.block_until_ready(y5)
    np.testing.assert_allclose(np.asarray(y5),
                               np.asarray(jnp.mean(x5, axis=(2, 3))),
                               rtol=1e-5, atol=1e-5)

    # 6) Non-contiguous reduce dims -> two chained no-transpose passes.
    x6 = jax.random.normal(keys[5], (2, 4, 6, 16), jnp.float32)
    y6 = pallas_mean(x6, dim=[1, 3])
    jax.block_until_ready(y6)
    np.testing.assert_allclose(np.asarray(y6),
                               np.asarray(jnp.mean(x6, axis=(1, 3))),
                               rtol=1e-5, atol=1e-5)

    # 7) Column-output R-tiled path (K < 8 rows).
    x7 = jax.random.normal(keys[6], (1, 1, 4, 300), jnp.float32)
    y7 = pallas_mean(x7, dim=3, block_cols=128)
    jax.block_until_ready(y7)
    np.testing.assert_allclose(np.asarray(y7),
                               np.asarray(jnp.mean(x7, axis=3)),
                               rtol=1e-5, atol=1e-5)

    # 8) bf16 input (f32 accumulation in-kernel).
    x8 = jax.random.normal(keys[7], (2, 4, 16, 16), jnp.float32).astype(
        jnp.bfloat16)
    y8 = pallas_mean(x8, dim=[2, 3])
    jax.block_until_ready(y8)
    ref8 = jnp.mean(x8.astype(jnp.float32), axis=(2, 3))
    np.testing.assert_allclose(np.asarray(y8).astype(np.float32),
                               np.asarray(ref8), rtol=1e-2, atol=1e-2)

    print("KERNEL_OK")
</pallas_src>

<mosaic_0001>
module attributes {stable_mosaic.version = 11 : i64} {
  func.func @_mean_full_r_lane_dense_kernel(%arg0: i32, %arg1: memref<8x256xf32, #tpu.memory_space<vmem>>, %arg2: memref<1x8xf32, #tpu.memory_space<vmem>>) attributes {dimension_semantics = [#tpu.dimension_semantics<parallel>], iteration_bounds = array<i64: 1>, scalar_prefetch = 0 : i64, scratch_operands = 0 : i64, tpu.core_type = #tpu.core_type<tc>, window_params = [{transform_indices = @transform_0, window_bounds = array<i64: 8, 256>}, {transform_indices = @transform_1, window_bounds = array<i64: 1, 8>}]} {
    %c0 = arith.constant 0 : index
    %c0_0 = arith.constant 0 : index
    %0 = vector.load %arg1[%c0, %c0_0] : memref<8x256xf32, #tpu.memory_space<vmem>>, vector<8x128xf32>
    %c0_1 = arith.constant 0 : index
    %c128 = arith.constant 128 : index
    %1 = vector.load %arg1[%c0_1, %c128] : memref<8x256xf32, #tpu.memory_space<vmem>>, vector<8x128xf32>
    %2 = arith.addf %0, %1 : vector<8x128xf32>
    %3 = tpu.transpose %2, [1, 0] : vector<8x128xf32> -> vector<128x8xf32>
    %cst = arith.constant dense<0.000000e+00> : vector<8xf32>
    %4 = vector.multi_reduction <add>, %3, %cst [0] : vector<128x8xf32> to vector<8xf32>
    %5 = vector.shape_cast %4 : vector<8xf32> to vector<1x8xf32>
    %cst_2 = arith.constant 3.906250e-03 : f32
    %6 = vector.broadcast %cst_2 : f32 to vector<1x8xf32>
    %7 = arith.mulf %5, %6 : vector<1x8xf32>
    %c0_3 = arith.constant 0 : index
    %c0_4 = arith.constant 0 : index
    %8 = vector.load %arg2[%c0_3, %c0_4] : memref<1x8xf32, #tpu.memory_space<vmem>>, vector<1x8xf32>
    tpu.vector_store %arg2[%c0_3, %c0_4], %7 {strides = array<i32>} : memref<1x8xf32, #tpu.memory_space<vmem>>, vector<1x8xf32>,
    return
  }
  func.func @transform_0(%arg0: i32) -> (i32, i32) {
    %c0_i32 = arith.constant 0 : i32
    %c0_i32_0 = arith.constant 0 : i32
    return %arg0, %c0_i32 : i32, i32
  }
  func.func @transform_1(%arg0: i32) -> (i32, i32) {
    %c0_i32 = arith.constant 0 : i32
    %c0_i32_0 = arith.constant 0 : i32
    return %arg0, %c0_i32 : i32, i32
  }
}

</mosaic_0001>

<bundles_post_ra>
// kernel: tpu_custom_call.1
= control target key start
LH: loop header
LB: loop body
LE: loop exit
PB: predicated region body
PF: predicated region fallthrough
CT: control target
= control target key end

     0   :  { %6 = vsyncpa [#allocation3], 0  ;;  %s215_s0 = inlined_call_operand.hbm [shape: f32[8,256], index: 0, kind: input, shape index: {}]   ;;  %s216_s1 = inlined_call_operand.hbm [shape: f32[1,8], index: 1, kind: output, shape index: {}]  }
   0x1   :  { %7 = vsyncpa [#allocation4], 0  ;;  %s163_s6 = smov [#allocation2]   ;;  %s115_s10 = scalar_lea.hbm %s215_s0, 256 }
   0x2   :  { %s14_s7 = sshll.u32 %s163_s6, 4  ;;  %p116_p0 = scmp.ne.s32.totalorder %s215_s0, %s115_s10  ;;  %s15_s7 = int_to_ptr.vmem [resolvable:$true] %s14_s7 }
   0x3   :  { %p119_p1 = scmp.lt.u32.totalorder %s115_s10, %s215_s0 }
   0x5   :  { %p121_p2 = pnand %p119_p1, %p116_p0 }
   0x7   :  { %124 = shalt.err (!%p121_p2)
}
   0x8   :  { %s125_s15 = scalar_lea.vmem %s15_s7, 256  ;;  %p130_p4 = scmp.lt.s32.totalorder %s15_s7, %s15_s7 }
   0x9   :  { %p126_p3 = scmp.ne.s32.totalorder %s15_s7, %s125_s15  ;;  %p131_p5 = scmp.lt.s32.totalorder %s125_s15, %s125_s15 }
   0xb   :  { %p132_p6 = por %p131_p5, %p130_p4 }
   0xd   :  { %p133_p7 = pnand %p132_p6, %p126_p3 }
   0xf   :  { %136 = shalt.err (!%p133_p7)
}
  0x10   :  { %17 = dma.hbm_to_vmem [thread:$0]  %s215_s0, 256, %s15_s7, [#allocation3]  }
  0x11   :  { %159 = dma.done.wait [#allocation3], 256  }
  0x12   :  { %160 = vsyncadd [#allocation3], 4294967040  ;;  %v21_v0 = vld [vmem:[#allocation2] sm:$0xff]  ;;  %v22_v1 = vld [vmem:[#allocation2 + $0x8] sm:$0xff]  ;;  %vm56_vm0 = vcmask 64512   ;;  %s164_s0 = smov [#allocation5]  }
  0x13   :  { %v23_v2 = vadd.f32 %v22_v1, %v21_v0  ;;  %s103_s18 = sshll.u32 %s164_s0, 4  ;;  %vm95_vm1 = vcmask 57344   ;;  %s104_s18 = int_to_ptr.vmem [resolvable:$true] %s103_s18 }
  0x14   :  { %s137_s19 = scalar_lea.vmem %s104_s18, 16  ;;  %s141_s20 = scalar_lea.vmem %s104_s18, 32 }
  0x15   :  { %24 = vxpose.xlu0.b32.start.end [1/1] (short) %v23_v2, 128  ;;  %p138_p8 = scmp.ne.s32.totalorder %s104_s18, %s137_s19  ;;  %p142_p9 = scmp.lt.s32.totalorder %s104_s18, %s104_s18 }
  0x16   :  { %p143_p10 = scmp.lt.s32.totalorder %s141_s20, %s137_s19 }
  0x18   :  { %p144_p11 = por %p143_p10, %p142_p9 }
  0x1a   :  { %p145_p12 = pnand %p144_p11, %p138_p8 }
  0x95   :  { %v40_v3 = vpop.trf.xlu0 }
  0x96   :  { %v57_v13 = vsel %vm56_vm0, %v40_v3, 0.0 }
  0x99   :  { %v41_v4 = vpop.trf.xlu0 }
  0x9a   :  { %v58_v11 = vsel %vm56_vm0, %v41_v4, 0.0 }
  0x9b   :  { %v59_v15 = vadd.f32 %v58_v11, %v57_v13 }
  0x9d   :  { %v42_v5 = vpop.trf.xlu0 }
  0x9e   :  { %v60_v14 = vsel %vm56_vm0, %v42_v5, 0.0 }
  0x9f   :  { %v61_v17 = vadd.f32 %v60_v14, %v59_v15 }
  0xa1   :  { %v43_v6 = vpop.trf.xlu0 }
  0xa2   :  { %v62_v16 = vsel %vm56_vm0, %v43_v6, 0.0 }
  0xa3   :  { %v63_v20 = vadd.f32 %v62_v16, %v61_v17 }
  0xa5   :  { %v44_v7 = vpop.trf.xlu0 }
  0xa6   :  { %v64_v19 = vsel %vm56_vm0, %v44_v7, 0.0 }
  0xa7   :  { %v65_v22 = vadd.f32 %v64_v19, %v63_v20 }
  0xa9   :  { %v45_v8 = vpop.trf.xlu0 }
  0xaa   :  { %v66_v21 = vsel %vm56_vm0, %v45_v8, 0.0 }
  0xab   :  { %v67_v25 = vadd.f32 %v66_v21, %v65_v22 }
  0xad   :  { %v46_v9 = vpop.trf.xlu0 }
  0xae   :  { %v68_v24 = vsel %vm56_vm0, %v46_v9, 0.0 }
  0xaf   :  { %v69_v27 = vadd.f32 %v68_v24, %v67_v25 }
  0xb1   :  { %v47_v10 = vpop.trf.xlu0 }
  0xb2   :  { %v70_v26 = vsel %vm56_vm0, %v47_v10, 0.0 }
  0xb3   :  { %v71_v30 = vadd.f32 %v70_v26, %v69_v27 }
  0xb5   :  { %v48_v12 = vpop.trf.xlu0 }
  0xb6   :  { %v72_v29 = vsel %vm56_vm0, %v48_v12, 0.0 }
  0xb7   :  { %v73_v32 = vadd.f32 %v72_v29, %v71_v30 }
  0xb9   :  { %v49_v18 = vpop.trf.xlu0 }
  0xba   :  { %v74_v31 = vsel %vm56_vm0, %v49_v18, 0.0 }
  0xbb   :  { %v75_v35 = vadd.f32 %v74_v31, %v73_v32 }
  0xbd   :  { %v50_v23 = vpop.trf.xlu0 }
  0xbe   :  { %v76_v34 = vsel %vm56_vm0, %v50_v23, 0.0 }
  0xbf   :  { %v77_v37 = vadd.f32 %v76_v34, %v75_v35 }
  0xc1   :  { %v51_v28 = vpop.trf.xlu0 }
  0xc2   :  { %v78_v36 = vsel %vm56_vm0, %v51_v28, 0.0 }
  0xc3   :  { %v79_v40 = vadd.f32 %v78_v36, %v77_v37 }
  0xc5   :  { %v52_v33 = vpop.trf.xlu0 }
  0xc6   :  { %v80_v39 = vsel %vm56_vm0, %v52_v33, 0.0 }
  0xc7   :  { %v81_v42 = vadd.f32 %v80_v39, %v79_v40 }
  0xc9   :  { %v53_v38 = vpop.trf.xlu0 }
  0xca   :  { %v82_v41 = vsel %vm56_vm0, %v53_v38, 0.0 }
  0xcb   :  { %v83_v45 = vadd.f32 %v82_v41, %v81_v42 }
  0xcd   :  { %v54_v43 = vpop.trf.xlu0 }
  0xce   :  { %v84_v44 = vsel %vm56_vm0, %v54_v43, 0.0 }
  0xcf   :  { %v85_v46 = vadd.f32 %v84_v44, %v83_v45 }
  0xd1   :  { %v55_v47 = vpop.trf.xlu0 }
  0xd2   :  { %v86_v48 = vsel %vm56_vm0, %v55_v47, 0.0 }
  0xd3   :  { %v87_v49 = vadd.f32 %v86_v48, %v85_v46 }
  0xd5   :  { %v88_v50 = vrot.slane %v87_v49, 4 }
  0xd7   :  { %v89_v51 = vadd.f32 %v88_v50, %v87_v49 }
  0xd9   :  { %v90_v52 = vrot.slane %v89_v51, 2 }
  0xdb   :  { %v91_v53 = vadd.f32 %v90_v52, %v89_v51 }
  0xdd   :  { %v92_v54 = vrot.slane %v91_v53, 1 }
  0xdf   :  { %v93_v55 = vadd.f32 %v92_v54, %v91_v53 }
  0xe1   :  { %v94_v56 = vmul.f32 0.00390625, %v93_v55 }
  0xe3   :  { %96 = vst.msk [vmem:[#allocation5] sm:$0x1] %vm95_vm1, %v94_v56 }
  0xe4   :  { %148 = shalt.err (!%p145_p12)
}
  0xe5   :  { %s149_s23 = scalar_lea.hbm %s216_s1, 16 }
  0xe6   :  { %p150_p13 = scmp.ne.s32.totalorder %s216_s1, %s149_s23  ;;  %p153_p0 = scmp.lt.u32.totalorder %s149_s23, %s216_s1 }
  0xe8   :  { %p155_p1 = pnand %p153_p0, %p150_p13 }
  0xea   :  { %158 = shalt.err (!%p155_p1)
}
  0xeb   :  { %106 = dma.vmem_to_hbm [thread:$0]  %s104_s18, 16, %s216_s1, [#allocation4]  }
  0xec   :  { %161 = dma.done.wait [#allocation4], 16  }
  0xed   :  { %162 = vsyncadd [#allocation4], 4294967280 }
  0xee   :  { %110 = vsyncpa [#allocation3], 1 }
  0xef   :  { %111 = vsyncpa [#allocation4], 1 }

</bundles_post_ra>
